<compile_context>
chip_gen: v6e
topology: v6e:2x2x1
jax: 0.10.0
libtpu: 0.0.40
codegen_flags: <defaults>
</compile_context>

<pallas_src>
import numpy as np
import jax
import jax.numpy as jnp
from jax.experimental import pallas as pl
from jax.experimental.pallas import tpu as pltpu

EPS = 1e-5


def resblock_kernel(a_ref, not_first_ref, not_last_ref,
                    w1_ref, b1_ref, g1_ref, beta1_ref,
                    w2_ref, b2_ref, g2_ref, beta2_ref,
                    o_ref):
    a = a_ref[...]                      # (C, NL) f32, lane axis = N*L
    not_first = not_first_ref[...]      # (1, NL): 0.0 where l == 0   within its sample
    not_last = not_last_ref[...]        # (1, NL): 0.0 where l == L-1 within its sample
    nl = a.shape[1]
    inv_cnt = 1.0 / float(nl)           # BatchNorm count = N * L (static at trace time)

    def conv3(x, w_ref, b_ref):
        # k=3 "same" 1-D conv = 3 accumulated MXU matmuls on lane-shifted activations.
        # w_ref: (3, C, C) with w_ref[k] applied to tap x[l + k - 1].
        zero_col = jnp.zeros_like(x[:, :1])
        x_m1 = jnp.concatenate([zero_col, x[:, :-1]], axis=1) * not_first  # x[l-1]
        x_p1 = jnp.concatenate([x[:, 1:], zero_col], axis=1) * not_last    # x[l+1]
        y = jnp.dot(w_ref[1], x, preferred_element_type=jnp.float32)
        y = y + jnp.dot(w_ref[0], x_m1, preferred_element_type=jnp.float32)
        y = y + jnp.dot(w_ref[2], x_p1, preferred_element_type=jnp.float32)
        return y + b_ref[...]                                              # b: (C, 1)

    def bn_train(y, g_ref, beta_ref):
        # Single-pass training-mode BatchNorm1d: per-channel stats over all N*L lanes.
        s1 = jnp.sum(y, axis=1, keepdims=True)          # (C, 1)
        s2 = jnp.sum(y * y, axis=1, keepdims=True)      # (C, 1)
        mean = s1 * inv_cnt
        var = s2 * inv_cnt - mean * mean                # biased variance
        scale = jax.lax.rsqrt(var + EPS) * g_ref[...]   # EUP rsqrt
        shift = beta_ref[...] - mean * scale
        return y * scale + shift

    h = conv3(a, w1_ref, b1_ref)             # Conv1d(C, C, k=3, padding='same')
    h = bn_train(h, g1_ref, beta1_ref)       # BatchNorm1d (training stats)
    h = jnp.maximum(h, 0.0)                  # ReLU
    h = conv3(h, w2_ref, b2_ref)             # Conv1d(C, C, k=3, stride=1, padding=1)
    h = bn_train(h, g2_ref, beta2_ref)       # BatchNorm1d
    o_ref[...] = jnp.maximum(h + a, 0.0)     # residual (Identity skip) + ReLU


@jax.jit
def resblock_kaxn(x, params):
    """x: (N, C, L) float32 (PyTorch NCL layout). Returns (N, C, L)."""
    w1, b1, g1, beta1, w2, b2, g2, beta2 = params
    N, C, L = x.shape
    NL = N * L

    # Lane-dense layout: channels on sublanes, (sample, position) flattened onto lanes.
    a = jnp.transpose(x, (1, 0, 2)).reshape(C, NL)

    # Per-sample boundary masks for the +/-1 taps (tiny, built once from static shapes).
    l_idx = np.arange(NL) % L
    not_first = jnp.asarray((l_idx != 0).astype(np.float32)).reshape(1, NL)
    not_last = jnp.asarray((l_idx != L - 1).astype(np.float32)).reshape(1, NL)

    # PyTorch conv weight (C_out, C_in, 3) -> (3, C_out, C_in) so tap k is w[k] @ x[l+k-1].
    wk1 = jnp.transpose(w1, (2, 0, 1))
    wk2 = jnp.transpose(w2, (2, 0, 1))

    args = (a, not_first, not_last,
            wk1, b1.reshape(C, 1), g1.reshape(C, 1), beta1.reshape(C, 1),
            wk2, b2.reshape(C, 1), g2.reshape(C, 1), beta2.reshape(C, 1))

    flops = 2 * 2 * (3 * C) * C * NL + 24 * C * NL          # 2 convs + elementwise
    bytes_accessed = 4 * (2 * C * NL + 2 * NL + 2 * 3 * C * C + 8 * C)
    cost = pl.CostEstimate(flops=flops, transcendentals=2 * C,
                           bytes_accessed=bytes_accessed)

    out_flat = pl.pallas_call(
        resblock_kernel,
        out_shape=jax.ShapeDtypeStruct((C, NL), jnp.float32),
        in_specs=[pl.BlockSpec(memory_space=pltpu.MemorySpace.VMEM)] * len(args),
        out_specs=pl.BlockSpec(memory_space=pltpu.MemorySpace.VMEM),
        compiler_params=pltpu.CompilerParams(vmem_limit_bytes=64 * 1024 * 1024),
        cost_estimate=cost,
    )(*args)

    return jnp.transpose(out_flat.reshape(C, N, L), (1, 0, 2))


def reference(x, params):
    """Pure-JAX reference mirroring the PyTorch forward (training-mode BN)."""
    w1, b1, g1, beta1, w2, b2, g2, beta2 = params

    def conv(x, w, b):
        y = jax.lax.conv_general_dilated(
            x, w, window_strides=(1,), padding=((1, 1),),
            dimension_numbers=('NCH', 'OIH', 'NCH'))
        return y + b[None, :, None]

    def bn(y, g, beta):
        mean = jnp.mean(y, axis=(0, 2), keepdims=True)
        var = jnp.mean((y - mean) ** 2, axis=(0, 2), keepdims=True)
        return (y - mean) / jnp.sqrt(var + EPS) * g[None, :, None] + beta[None, :, None]

    h = jax.nn.relu(bn(conv(x, w1, b1), g1, beta1))
    h = bn(conv(h, w2, b2), g2, beta2)
    return jax.nn.relu(h + x)


if __name__ == "__main__":
    N, C, L = 2, 4, 16          # batch, channels (in == out), sequence length
    key = jax.random.PRNGKey(0)
    kx, kw1, kb1, kw2, kb2 = jax.random.split(key, 5)

    x = jax.random.normal(kx, (N, C, L), jnp.float32)

    # Deterministic parameter init (Conv1d-style fan-in scaling); BN gamma=1, beta=0.
    fan = C * 3
    w1 = jax.random.uniform(kw1, (C, C, 3), jnp.float32, -1.0, 1.0) / np.sqrt(fan)
    b1 = jax.random.uniform(kb1, (C,), jnp.float32, -1.0, 1.0) / np.sqrt(fan)
    w2 = jax.random.uniform(kw2, (C, C, 3), jnp.float32, -1.0, 1.0) / np.sqrt(fan)
    b2 = jax.random.uniform(kb2, (C,), jnp.float32, -1.0, 1.0) / np.sqrt(fan)
    g1 = jnp.ones((C,), jnp.float32); beta1 = jnp.zeros((C,), jnp.float32)
    g2 = jnp.ones((C,), jnp.float32); beta2 = jnp.zeros((C,), jnp.float32)
    params = (w1, b1, g1, beta1, w2, b2, g2, beta2)

    out = jax.block_until_ready(resblock_kaxn(x, params))
    ref = jax.block_until_ready(reference(x, params))
    np.testing.assert_allclose(np.asarray(out), np.asarray(ref), rtol=1e-4, atol=1e-4)

    print("KERNEL_OK")
</pallas_src>

<mosaic_0001>
module attributes {stable_mosaic.version = 11 : i64} {
  func.func @resblock_kernel(%arg0: memref<4x32xf32, #tpu.memory_space<vmem>>, %arg1: memref<1x32xf32, #tpu.memory_space<vmem>>, %arg2: memref<1x32xf32, #tpu.memory_space<vmem>>, %arg3: memref<3x4x4xf32, #tpu.memory_space<vmem>>, %arg4: memref<4x1xf32, #tpu.memory_space<vmem>>, %arg5: memref<4x1xf32, #tpu.memory_space<vmem>>, %arg6: memref<4x1xf32, #tpu.memory_space<vmem>>, %arg7: memref<3x4x4xf32, #tpu.memory_space<vmem>>, %arg8: memref<4x1xf32, #tpu.memory_space<vmem>>, %arg9: memref<4x1xf32, #tpu.memory_space<vmem>>, %arg10: memref<4x1xf32, #tpu.memory_space<vmem>>, %arg11: memref<4x32xf32, #tpu.memory_space<vmem>>) attributes {dimension_semantics = [], scalar_prefetch = 0 : i64, scratch_operands = 0 : i64, tpu.core_type = #tpu.core_type<tc>} {
    %c0 = arith.constant 0 : index
    %c0_0 = arith.constant 0 : index
    %0 = vector.load %arg0[%c0, %c0_0] : memref<4x32xf32, #tpu.memory_space<vmem>>, vector<4x32xf32>
    %c0_1 = arith.constant 0 : index
    %c0_2 = arith.constant 0 : index
    %1 = vector.load %arg1[%c0_1, %c0_2] : memref<1x32xf32, #tpu.memory_space<vmem>>, vector<1x32xf32>
    %c0_3 = arith.constant 0 : index
    %c0_4 = arith.constant 0 : index
    %2 = vector.load %arg2[%c0_3, %c0_4] : memref<1x32xf32, #tpu.memory_space<vmem>>, vector<1x32xf32>
    %cst = arith.constant 0.000000e+00 : f32
    %3 = vector.broadcast %cst : f32 to vector<4x1xf32>
    %4 = vector.extract_strided_slice %0 {offsets = [0, 0], sizes = [4, 31], strides = [1, 1]} : vector<4x32xf32> to vector<4x31xf32>
    %5 = tpu.concatenate %3, %4 in 1 : vector<4x1xf32>, vector<4x31xf32> -> vector<4x32xf32>
    %6 = vector.broadcast %1 : vector<1x32xf32> to vector<4x32xf32>
    %7 = arith.mulf %5, %6 : vector<4x32xf32>
    %8 = vector.extract_strided_slice %0 {offsets = [0, 1], sizes = [4, 31], strides = [1, 1]} : vector<4x32xf32> to vector<4x31xf32>
    %9 = tpu.concatenate %8, %3 in 1 : vector<4x31xf32>, vector<4x1xf32> -> vector<4x32xf32>
    %10 = vector.broadcast %2 : vector<1x32xf32> to vector<4x32xf32>
    %11 = arith.mulf %9, %10 : vector<4x32xf32>
    %c1 = arith.constant 1 : index
    %c0_5 = arith.constant 0 : index
    %c0_6 = arith.constant 0 : index
    %12 = vector.load %arg3[%c1, %c0_5, %c0_6] : memref<3x4x4xf32, #tpu.memory_space<vmem>>, vector<1x4x4xf32>
    %13 = vector.shape_cast %12 : vector<1x4x4xf32> to vector<4x4xf32>
    %cst_7 = arith.constant dense<0.000000e+00> : vector<4x32xf32>
    %14 = tpu.matmul %13, %0, %cst_7 {dimension_numbers = #tpu.dot_dimension_numbers<[1], [0], [0], [1], [0, 0, 1, 1], [], []>} : vector<4x4xf32>, vector<4x32xf32>, vector<4x32xf32> -> vector<4x32xf32>
    %c0_8 = arith.constant 0 : index
    %c0_9 = arith.constant 0 : index
    %c0_10 = arith.constant 0 : index
    %15 = vector.load %arg3[%c0_8, %c0_9, %c0_10] : memref<3x4x4xf32, #tpu.memory_space<vmem>>, vector<1x4x4xf32>
    %16 = vector.shape_cast %15 : vector<1x4x4xf32> to vector<4x4xf32>
    %cst_11 = arith.constant dense<0.000000e+00> : vector<4x32xf32>
    %17 = tpu.matmul %16, %7, %cst_11 {dimension_numbers = #tpu.dot_dimension_numbers<[1], [0], [0], [1], [0, 0, 1, 1], [], []>} : vector<4x4xf32>, vector<4x32xf32>, vector<4x32xf32> -> vector<4x32xf32>
    %18 = arith.addf %14, %17 : vector<4x32xf32>
    %c2 = arith.constant 2 : index
    %c0_12 = arith.constant 0 : index
    %c0_13 = arith.constant 0 : index
    %19 = vector.load %arg3[%c2, %c0_12, %c0_13] : memref<3x4x4xf32, #tpu.memory_space<vmem>>, vector<1x4x4xf32>
    %20 = vector.shape_cast %19 : vector<1x4x4xf32> to vector<4x4xf32>
    %cst_14 = arith.constant dense<0.000000e+00> : vector<4x32xf32>
    %21 = tpu.matmul %20, %11, %cst_14 {dimension_numbers = #tpu.dot_dimension_numbers<[1], [0], [0], [1], [0, 0, 1, 1], [], []>} : vector<4x4xf32>, vector<4x32xf32>, vector<4x32xf32> -> vector<4x32xf32>
    %22 = arith.addf %18, %21 : vector<4x32xf32>
    %c0_15 = arith.constant 0 : index
    %c0_16 = arith.constant 0 : index
    %23 = vector.load %arg4[%c0_15, %c0_16] : memref<4x1xf32, #tpu.memory_space<vmem>>, vector<4x1xf32>
    %24 = vector.broadcast %23 : vector<4x1xf32> to vector<4x32xf32>
    %25 = arith.addf %22, %24 : vector<4x32xf32>
    %cst_17 = arith.constant dense<0.000000e+00> : vector<4xf32>
    %26 = vector.multi_reduction <add>, %25, %cst_17 [1] : vector<4x32xf32> to vector<4xf32>
    %27 = vector.shape_cast %26 : vector<4xf32> to vector<4x1xf32>
    %28 = arith.mulf %25, %25 : vector<4x32xf32>
    %cst_18 = arith.constant dense<0.000000e+00> : vector<4xf32>
    %29 = vector.multi_reduction <add>, %28, %cst_18 [1] : vector<4x32xf32> to vector<4xf32>
    %30 = vector.shape_cast %29 : vector<4xf32> to vector<4x1xf32>
    %cst_19 = arith.constant 3.125000e-02 : f32
    %31 = vector.broadcast %cst_19 : f32 to vector<4x1xf32>
    %32 = arith.mulf %27, %31 : vector<4x1xf32>
    %cst_20 = arith.constant 3.125000e-02 : f32
    %33 = vector.broadcast %cst_20 : f32 to vector<4x1xf32>
    %34 = arith.mulf %30, %33 : vector<4x1xf32>
    %35 = arith.mulf %32, %32 : vector<4x1xf32>
    %36 = arith.subf %34, %35 : vector<4x1xf32>
    %cst_21 = arith.constant 9.99999974E-6 : f32
    %37 = vector.broadcast %cst_21 : f32 to vector<4x1xf32>
    %38 = arith.addf %36, %37 : vector<4x1xf32>
    %39 = math.rsqrt %38 : vector<4x1xf32>
    %c0_22 = arith.constant 0 : index
    %c0_23 = arith.constant 0 : index
    %40 = vector.load %arg5[%c0_22, %c0_23] : memref<4x1xf32, #tpu.memory_space<vmem>>, vector<4x1xf32>
    %41 = arith.mulf %39, %40 : vector<4x1xf32>
    %c0_24 = arith.constant 0 : index
    %c0_25 = arith.constant 0 : index
    %42 = vector.load %arg6[%c0_24, %c0_25] : memref<4x1xf32, #tpu.memory_space<vmem>>, vector<4x1xf32>
    %43 = arith.mulf %32, %41 : vector<4x1xf32>
    %44 = arith.subf %42, %43 : vector<4x1xf32>
    %45 = vector.broadcast %41 : vector<4x1xf32> to vector<4x32xf32>
    %46 = arith.mulf %25, %45 : vector<4x32xf32>
    %47 = vector.broadcast %44 : vector<4x1xf32> to vector<4x32xf32>
    %48 = arith.addf %46, %47 : vector<4x32xf32>
    %cst_26 = arith.constant 0.000000e+00 : f32
    %49 = vector.broadcast %cst_26 : f32 to vector<4x32xf32>
    %50 = arith.maximumf %48, %49 : vector<4x32xf32>
    %cst_27 = arith.constant 0.000000e+00 : f32
    %51 = vector.broadcast %cst_27 : f32 to vector<4x1xf32>
    %52 = vector.extract_strided_slice %50 {offsets = [0, 0], sizes = [4, 31], strides = [1, 1]} : vector<4x32xf32> to vector<4x31xf32>
    %53 = tpu.concatenate %51, %52 in 1 : vector<4x1xf32>, vector<4x31xf32> -> vector<4x32xf32>
    %54 = vector.broadcast %1 : vector<1x32xf32> to vector<4x32xf32>
    %55 = arith.mulf %53, %54 : vector<4x32xf32>
    %56 = vector.extract_strided_slice %50 {offsets = [0, 1], sizes = [4, 31], strides = [1, 1]} : vector<4x32xf32> to vector<4x31xf32>
    %57 = tpu.concatenate %56, %51 in 1 : vector<4x31xf32>, vector<4x1xf32> -> vector<4x32xf32>
    %58 = vector.broadcast %2 : vector<1x32xf32> to vector<4x32xf32>
    %59 = arith.mulf %57, %58 : vector<4x32xf32>
    %c1_28 = arith.constant 1 : index
    %c0_29 = arith.constant 0 : index
    %c0_30 = arith.constant 0 : index
    %60 = vector.load %arg7[%c1_28, %c0_29, %c0_30] : memref<3x4x4xf32, #tpu.memory_space<vmem>>, vector<1x4x4xf32>
    %61 = vector.shape_cast %60 : vector<1x4x4xf32> to vector<4x4xf32>
    %cst_31 = arith.constant dense<0.000000e+00> : vector<4x32xf32>
    %62 = tpu.matmul %61, %50, %cst_31 {dimension_numbers = #tpu.dot_dimension_numbers<[1], [0], [0], [1], [0, 0, 1, 1], [], []>} : vector<4x4xf32>, vector<4x32xf32>, vector<4x32xf32> -> vector<4x32xf32>
    %c0_32 = arith.constant 0 : index
    %c0_33 = arith.constant 0 : index
    %c0_34 = arith.constant 0 : index
    %63 = vector.load %arg7[%c0_32, %c0_33, %c0_34] : memref<3x4x4xf32, #tpu.memory_space<vmem>>, vector<1x4x4xf32>
    %64 = vector.shape_cast %63 : vector<1x4x4xf32> to vector<4x4xf32>
    %cst_35 = arith.constant dense<0.000000e+00> : vector<4x32xf32>
    %65 = tpu.matmul %64, %55, %cst_35 {dimension_numbers = #tpu.dot_dimension_numbers<[1], [0], [0], [1], [0, 0, 1, 1], [], []>} : vector<4x4xf32>, vector<4x32xf32>, vector<4x32xf32> -> vector<4x32xf32>
    %66 = arith.addf %62, %65 : vector<4x32xf32>
    %c2_36 = arith.constant 2 : index
    %c0_37 = arith.constant 0 : index
    %c0_38 = arith.constant 0 : index
    %67 = vector.load %arg7[%c2_36, %c0_37, %c0_38] : memref<3x4x4xf32, #tpu.memory_space<vmem>>, vector<1x4x4xf32>
    %68 = vector.shape_cast %67 : vector<1x4x4xf32> to vector<4x4xf32>
    %cst_39 = arith.constant dense<0.000000e+00> : vector<4x32xf32>
    %69 = tpu.matmul %68, %59, %cst_39 {dimension_numbers = #tpu.dot_dimension_numbers<[1], [0], [0], [1], [0, 0, 1, 1], [], []>} : vector<4x4xf32>, vector<4x32xf32>, vector<4x32xf32> -> vector<4x32xf32>
    %70 = arith.addf %66, %69 : vector<4x32xf32>
    %c0_40 = arith.constant 0 : index
    %c0_41 = arith.constant 0 : index
    %71 = vector.load %arg8[%c0_40, %c0_41] : memref<4x1xf32, #tpu.memory_space<vmem>>, vector<4x1xf32>
    %72 = vector.broadcast %71 : vector<4x1xf32> to vector<4x32xf32>
    %73 = arith.addf %70, %72 : vector<4x32xf32>
    %cst_42 = arith.constant dense<0.000000e+00> : vector<4xf32>
    %74 = vector.multi_reduction <add>, %73, %cst_42 [1] : vector<4x32xf32> to vector<4xf32>
    %75 = vector.shape_cast %74 : vector<4xf32> to vector<4x1xf32>
    %76 = arith.mulf %73, %73 : vector<4x32xf32>
    %cst_43 = arith.constant dense<0.000000e+00> : vector<4xf32>
    %77 = vector.multi_reduction <add>, %76, %cst_43 [1] : vector<4x32xf32> to vector<4xf32>
    %78 = vector.shape_cast %77 : vector<4xf32> to vector<4x1xf32>
    %cst_44 = arith.constant 3.125000e-02 : f32
    %79 = vector.broadcast %cst_44 : f32 to vector<4x1xf32>
    %80 = arith.mulf %75, %79 : vector<4x1xf32>
    %cst_45 = arith.constant 3.125000e-02 : f32
    %81 = vector.broadcast %cst_45 : f32 to vector<4x1xf32>
    %82 = arith.mulf %78, %81 : vector<4x1xf32>
    %83 = arith.mulf %80, %80 : vector<4x1xf32>
    %84 = arith.subf %82, %83 : vector<4x1xf32>
    %cst_46 = arith.constant 9.99999974E-6 : f32
    %85 = vector.broadcast %cst_46 : f32 to vector<4x1xf32>
    %86 = arith.addf %84, %85 : vector<4x1xf32>
    %87 = math.rsqrt %86 : vector<4x1xf32>
    %c0_47 = arith.constant 0 : index
    %c0_48 = arith.constant 0 : index
    %88 = vector.load %arg9[%c0_47, %c0_48] : memref<4x1xf32, #tpu.memory_space<vmem>>, vector<4x1xf32>
    %89 = arith.mulf %87, %88 : vector<4x1xf32>
    %c0_49 = arith.constant 0 : index
    %c0_50 = arith.constant 0 : index
    %90 = vector.load %arg10[%c0_49, %c0_50] : memref<4x1xf32, #tpu.memory_space<vmem>>, vector<4x1xf32>
    %91 = arith.mulf %80, %89 : vector<4x1xf32>
    %92 = arith.subf %90, %91 : vector<4x1xf32>
    %93 = vector.broadcast %89 : vector<4x1xf32> to vector<4x32xf32>
    %94 = arith.mulf %73, %93 : vector<4x32xf32>
    %95 = vector.broadcast %92 : vector<4x1xf32> to vector<4x32xf32>
    %96 = arith.addf %94, %95 : vector<4x32xf32>
    %97 = arith.addf %96, %0 : vector<4x32xf32>
    %cst_51 = arith.constant 0.000000e+00 : f32
    %98 = vector.broadcast %cst_51 : f32 to vector<4x32xf32>
    %99 = arith.maximumf %97, %98 : vector<4x32xf32>
    %c0_52 = arith.constant 0 : index
    %c0_53 = arith.constant 0 : index
    %100 = vector.load %arg11[%c0_52, %c0_53] : memref<4x32xf32, #tpu.memory_space<vmem>>, vector<4x32xf32>
    tpu.vector_store %arg11[%c0_52, %c0_53], %99 {strides = array<i32>} : memref<4x32xf32, #tpu.memory_space<vmem>>, vector<4x32xf32>,
    return
  }
}

</mosaic_0001>

<bundles_post_ra>
// kernel: resblock_kaxn.1
= control target key start
LH: loop header
LB: loop body
LE: loop exit
PB: predicated region body
PF: predicated region fallthrough
CT: control target
= control target key end

     0   :  { %vm73_vm0 = vcmask 1043456   ;;  %v699_v1 = vmov 0.0   ;;  %s700_s19 = smov 1   ;;  %vm701_vm1 = vmmov 0   ;;  %vm69_vm2 = vcmask 31744   ;;  %s703_s23 = smov 127   ;;  %s869_s0 = inlined_call_operand.vmem [shape: f32[4,32], index: 0, kind: input, shape index: {}]   ;;  %s870_s3 = inlined_call_operand.vmem [shape: f32[3,4,4], index: 3, kind: input, shape index: {}]   ;;  %s871_s4 = inlined_call_operand.vmem [shape: f32[4,1], index: 4, kind: input, shape index: {}]   ;;  %s872_s1 = inlined_call_operand.vmem [shape: f32[1,32], index: 1, kind: input, shape index: {}]   ;;  %s873_s2 = inlined_call_operand.vmem [shape: f32[1,32], index: 2, kind: input, shape index: {}]   ;;  %s874_s5 = inlined_call_operand.vmem [shape: f32[4,1], index: 5, kind: input, shape index: {}]   ;;  %s875_s6 = inlined_call_operand.vmem [shape: f32[4,1], index: 6, kind: input, shape index: {}]   ;;  %s876_s7 = inlined_call_operand.vmem [shape: f32[3,4,4], index: 7, kind: input, shape index: {}]   ;;  %s877_s8 = inlined_call_operand.vmem [shape: f32[4,1], index: 8, kind: input, shape index: {}]   ;;  %s878_s9 = inlined_call_operand.vmem [shape: f32[4,1], index: 9, kind: input, shape index: {}]   ;;  %s879_s10 = inlined_call_operand.vmem [shape: f32[4,1], index: 10, kind: input, shape index: {}]   ;;  %s880_s11 = inlined_call_operand.vmem [shape: f32[4,32], index: 11, kind: output, shape index: {}]  }
   0x1   :  { %v767_v0 = vld [vmem:[%s869_s0] sm:$0xf]  ;;  %658 = vmatprep.subr.mxu0 %v699_v1  ;;  %663 = vmatprep.subr.mxu1 %v699_v1  ;;  %v630_v2 = vld [vmem:[%s870_s3 + $0x4] sm:$0xf]  ;;  %v702_v4 = vmov 0   ;;  %vm45_vm3 = vcmask 7168  }
   0x2   :  { %42 = vrot.lane.b32.xlu0 %v767_v0, %s700_s19  ;;  %660 = vmatprep.mubr.msk.f32.mxu0 %vm701_vm1, %v699_v1  ;;  %v301_v3 = vld [vmem:[%s871_s4] sm:$0xf]  ;;  %vm57_vm4 = vcmask 252928   ;;  %v635_v14 = vld [vmem:[%s870_s3 + $0x8] sm:$0xf]  ;;  %vm308_vm5 = vcmask 257024  }
   0x3   :  { %665 = vmatprep.mubr.msk.f32.mxu1 %vm701_vm1, %v699_v1  ;;  %664 = vmatpush3.msk.msra.mxu1 %vm73_vm0, %v767_v0  ;;  %v794_v5 = vld [vmem:[%s872_s1] ss:$0 sm:$0xff]  ;;  %v638_v46 = vld [vmem:[%s876_s7 + $0x4] sm:$0xf]  ;;  %v643_v55 = vld [vmem:[%s876_s7 + $0x8] sm:$0xf] }
   0x4   :  { %666 = vmatmul.mubr.msk.f32.vlgmr.msra.gmra.mxu1 %vm69_vm2, %v630_v2  ;;  %693 = vset.pattern.permute.xlu1 %v702_v4  ;;  %v68_v9 = vld [vmem:[%s870_s3] sm:$0xf] }
   0x5   :  { %304 = vperm.xlu1 %693, %v301_v3   ;;  %694 = vset.pattern.permute.xlu0 %v702_v4  ;;  %v804_v10 = vld [vmem:[%s873_s2] ss:$0 sm:$0xff] }
   0x6   :  { %54 = vrot.lane.b32.xlu0 %v767_v0, %s703_s23  ;;  %673 = vmatprep.subr.mxu1 %v699_v1  ;;  %v322_v35 = vld [vmem:[%s874_s5] sm:$0xf] }
   0x7   :  { %675 = vmatprep.mubr.msk.f32.mxu1 %vm701_vm1, %v699_v1  ;;  %v324_v38 = vld [vmem:[%s875_s6] sm:$0xf] }
   0x8   :  { %v584_v47 = vld [vmem:[%s877_s8] sm:$0xf] }
   0x9   :  { %v353_v51 = vld [vmem:[%s876_s7] sm:$0xf] }
  0x74   :  { %v43_v6 = vpop.permute.xlu0 %42 }
  0x75   :  { %v46_v7 = vsel %vm45_vm3, 0.0, %v43_v6 }
  0x76   :  { %v53_v8 = vmul.f32 %v794_v5, %v46_v7 }
  0x78   :  { %659 = vmatpush3.msk.msra.mxu0 %vm73_vm0, %v53_v8  ;;  %v55_v11 = vpop.permute.xlu0 %54 }
  0x79   :  { %v58_v12 = vsel %vm57_vm4, %v55_v11, 0.0  ;;  %661 = vmatmul.mubr.msk.f32.vlgmr.msra.gmra.mxu0 %vm69_vm2, %v68_v9  ;;  %668 = vmatprep.subr.mxu0 %v699_v1 }
  0x7a   :  { %v65_v13 = vmul.f32 %v804_v10, %v58_v12  ;;  %670 = vmatprep.mubr.msk.f32.mxu0 %vm701_vm1, %v699_v1 }
  0x7c   :  { %669 = vmatpush3.msk.msra.mxu0 %vm73_vm0, %v65_v13  ;;  %v604_v13 = vld [vmem:[%s878_s9] sm:$0xf] }
  0x7d   :  { %671 = vmatmul.mubr.msk.f32.vlgmr.msra.gmra.mxu0 %vm69_vm2, %v635_v14  ;;  %678 = vmatprep.subr.mxu0 %v699_v1 }
  0x7e   :  { %680 = vmatprep.mubr.msk.f32.mxu0 %vm701_vm1, %v699_v1 }
  0x80   :  { %v305_v21 = vpop.permute.xlu1 %304 }
  0xc4   :  { %v218_v15 = vpop.f32.mrf.mxu1 }
  0xc6   :  { %v667_v16 = vpop.f32.mrf.mxu1 }
  0xc7   :  { %v606_v16 = vld [vmem:[%s879_s10] sm:$0xf] }
 0x139   :  { %v143_v17 = vpop.f32.mrf.mxu0 }
 0x13a   :  { %v219_v19 = vadd.f32 %v218_v15, %v143_v17 }
 0x13b   :  { %v662_v18 = vpop.f32.mrf.mxu0 }
 0x13d   :  { %v296_v20 = vpop.f32.mrf.mxu0 }
 0x13e   :  { %v300_v22 = vadd.f32 %v296_v20, %v219_v19 }
 0x13f   :  { %v672_v23 = vpop.f32.mrf.mxu0 }
 0x140   :  { %v307_v24 = vadd.f32 %v305_v21, %v300_v22 }
 0x142   :  { %v309_v25 = vsel %vm308_vm5, %v307_v24, 0.0  ;;  %v312_v26 = vmul.f32 %v307_v24, %v307_v24 }
 0x143   :  { %310 = vadd.xlane.f32.xlu1 %v309_v25 }
 0x144   :  { %v313_v27 = vsel %vm308_vm5, %v312_v26, 0.0 }
 0x145   :  { %314 = vadd.xlane.f32.xlu0 %v313_v27 }
 0x1cc   :  { %v311_v28 = vpop.xlane.xlu1 %310 }
 0x1cd   :  { %v316_v29 = vmul.f32 0.03125, %v311_v28 }
 0x1ce   :  { %v315_v30 = vpop.xlane.xlu0 %314 }
 0x1cf   :  { %v318_v31 = vmul.f32 %v316_v29, %v316_v29  ;;  %v317_v32 = vmul.f32 0.03125, %v315_v30 }
 0x1d1   :  { %v319_v33 = vsub.f32 %v317_v32, %v318_v31 }
 0x1d3   :  { %v320_v34 = vadd.f32 1e-05, %v319_v33 }
 0x1d5   :  { %695 = vrsqrt.f32 %v320_v34 }
 0x1e2   :  { %v696_v36 = vpop.eup %695 }
 0x1e3   :  { %v323_v37 = vmul.f32 %v696_v36, %v322_v35 }
 0x1e5   :  { %329 = vperm.xlu0 %694, %v323_v37   ;;  %v325_v39 = vmul.f32 %v323_v37, %v316_v29 }
 0x1e7   :  { %v326_v40 = vsub.f32 %v324_v38, %v325_v39 }
 0x1e9   :  { %335 = vperm.xlu1 %693, %v326_v40  }
 0x260   :  { %v330_v41 = vpop.permute.xlu0 %329 }
 0x261   :  { %v332_v42 = vmul.f32 %v330_v41, %v307_v24 }
 0x264   :  { %v336_v43 = vpop.permute.xlu1 %335 }
 0x265   :  { %v338_v44 = vadd.f32 %v336_v43, %v332_v42 }
 0x267   :  { %v339_v45 = vmax.f32 %v338_v44, 0.0 }
 0x269   :  { %341 = vrot.lane.b32.xlu1 %v339_v45, %s700_s19  ;;  %679 = vmatpush3.msk.msra.mxu0 %vm73_vm0, %v339_v45 }
 0x26a   :  { %681 = vmatmul.mubr.msk.f32.vlgmr.msra.gmra.mxu0 %vm69_vm2, %v638_v46 }
 0x26d   :  { %346 = vrot.lane.b32.xlu1 %v339_v45, %s703_s23 }
 0x271   :  { %587 = vperm.xlu1 %693, %v584_v47  }
 0x2db   :  { %v342_v48 = vpop.permute.xlu1 %341 }
 0x2dc   :  { %v344_v49 = vsel %vm45_vm3, 0.0, %v342_v48 }
 0x2dd   :  { %v345_v50 = vmul.f32 %v794_v5, %v344_v49 }
 0x2df   :  { %674 = vmatpush3.msk.msra.mxu1 %vm73_vm0, %v345_v50  ;;  %v347_v52 = vpop.permute.xlu1 %346 }
 0x2e0   :  { %v349_v53 = vsel %vm57_vm4, %v347_v52, 0.0  ;;  %676 = vmatmul.mubr.msk.f32.vlgmr.msra.gmra.mxu1 %vm69_vm2, %v353_v51  ;;  %683 = vmatprep.subr.mxu1 %v699_v1 }
 0x2e1   :  { %v350_v54 = vmul.f32 %v804_v10, %v349_v53  ;;  %685 = vmatprep.mubr.msk.f32.mxu1 %vm701_vm1, %v699_v1 }
 0x2e3   :  { %684 = vmatpush3.msk.msra.mxu1 %vm73_vm0, %v350_v54 }
 0x2e4   :  { %686 = vmatmul.mubr.msk.f32.vlgmr.msra.gmra.mxu1 %vm69_vm2, %v643_v55 }
 0x2ec   :  { %v588_v63 = vpop.permute.xlu1 %587 }
 0x32a   :  { %v501_v56 = vpop.f32.mrf.mxu0 }
 0x32c   :  { %v682_v57 = vpop.f32.mrf.mxu0 }
 0x3a0   :  { %v426_v58 = vpop.f32.mrf.mxu1 }
 0x3a1   :  { %v502_v60 = vadd.f32 %v501_v56, %v426_v58 }
 0x3a2   :  { %v677_v59 = vpop.f32.mrf.mxu1 }
 0x3a4   :  { %v579_v61 = vpop.f32.mrf.mxu1 }
 0x3a5   :  { %v583_v62 = vadd.f32 %v579_v61, %v502_v60 }
 0x3a6   :  { %v687_v2 = vpop.f32.mrf.mxu1 }
 0x3a7   :  { %v590_v3 = vadd.f32 %v588_v63, %v583_v62 }
 0x3a9   :  { %v591_v1 = vsel %vm308_vm5, %v590_v3, 0.0  ;;  %v594_v4 = vmul.f32 %v590_v3, %v590_v3 }
 0x3aa   :  { %592 = vadd.xlane.f32.xlu1 %v591_v1 }
 0x3ab   :  { %v595_v5 = vsel %vm308_vm5, %v594_v4, 0.0 }
 0x3ac   :  { %596 = vadd.xlane.f32.xlu0 %v595_v5 }
 0x433   :  { %v593_v6 = vpop.xlane.xlu1 %592 }
 0x434   :  { %v598_v7 = vmul.f32 0.03125, %v593_v6 }
 0x435   :  { %v597_v8 = vpop.xlane.xlu0 %596 }
 0x436   :  { %v600_v9 = vmul.f32 %v598_v7, %v598_v7  ;;  %v599_v10 = vmul.f32 0.03125, %v597_v8 }
 0x438   :  { %v601_v11 = vsub.f32 %v599_v10, %v600_v9 }
 0x43a   :  { %v602_v12 = vadd.f32 1e-05, %v601_v11 }
 0x43c   :  { %697 = vrsqrt.f32 %v602_v12 }
 0x449   :  { %v698_v14 = vpop.eup %697 }
 0x44a   :  { %v605_v15 = vmul.f32 %v698_v14, %v604_v13 }
 0x44c   :  { %611 = vperm.xlu1 %693, %v605_v15   ;;  %v607_v17 = vmul.f32 %v605_v15, %v598_v7 }
 0x44e   :  { %v608_v18 = vsub.f32 %v606_v16, %v607_v17 }
 0x450   :  { %617 = vperm.xlu0 %694, %v608_v18  }
 0x4c7   :  { %v612_v19 = vpop.permute.xlu1 %611 }
 0x4c8   :  { %v614_v20 = vmul.f32 %v612_v19, %v590_v3 }
 0x4cb   :  { %v618_v21 = vpop.permute.xlu0 %617 }
 0x4cc   :  { %v620_v22 = vadd.f32 %v618_v21, %v614_v20 }
 0x4ce   :  { %v621_v23 = vadd.f32 %v620_v22, %v767_v0 }
 0x4d0   :  { %v622_v24 = vmax.f32 %v621_v23, 0.0 }
 0x4d2   :  { %623 = vst.msk [vmem:[%s880_s11] sm:$0xf] %vm308_vm5, %v622_v24 }

</bundles_post_ra>
